<compile_context>
chip_gen: v7x
topology: tpu7x:2x2x1
jax: 0.10.0
libtpu: 0.0.40
codegen_flags: <defaults>
</compile_context>

<pallas_src>
import jax
import jax.numpy as jnp
from jax.experimental import pallas as pl
from jax.experimental.pallas import tpu as pltpu


LANE = 128      # output last dim padded to a multiple of this (lane-dense stores)
SUBLANE = 8


def _round_up(x, m):
    return ((x + m - 1) // m) * m


def _vmem_capacity_bytes():
    """Per-core VMEM capacity; conservative 64 MiB fallback (v7x)."""
    try:
        return int(pltpu.get_tpu_info().vmem_capacity_bytes)
    except Exception:
        return 64 << 20


def ffn_kernel(x_ref, w1_ref, w2_ref, w3_ref, b3_ref, o_ref):
    # x_ref: [tb, H]; w1/w2: [H, H] bf16; w3: [H, Op] bf16; b3: [1, Op] f32;
    # o_ref: [tb, Op].
    x = x_ref[...].astype(jnp.bfloat16)                       # bf16 into the MXU
    h = jnp.dot(x, w1_ref[...], preferred_element_type=jnp.float32)
    h = jnp.tanh(h)                                           # f32 tanh (EUP)
    h = jnp.dot(h.astype(jnp.bfloat16), w2_ref[...],
                preferred_element_type=jnp.float32)
    y = jnp.dot(h.astype(jnp.bfloat16), w3_ref[...],
                preferred_element_type=jnp.float32)
    y = y + b3_ref[...]                                       # f32 bias add (VPU)
    o_ref[...] = y.astype(o_ref.dtype)


def prepare_params(w1_t, w2_t, w3_t, b3):
    """One-time parameter preparation (call once, NOT per forward pass):
      * cast weights to MXU-native bf16 once (removes per-call cast HBM traffic),
      * pad W3 columns / bias to a lane-dense multiple of 128 so output stores
        are unmasked `vst` (the biggest store-side lever).
    """
    H = w1_t.shape[0]
    O = w3_t.shape[1]
    Op = _round_up(O, LANE)
    w3_p = jnp.pad(w3_t, ((0, 0), (0, Op - O))) if Op != O else w3_t
    b3_p = jnp.pad(b3, ((0, Op - O),)) if Op != O else b3
    return dict(
        w1=w1_t.astype(jnp.bfloat16),
        w2=w2_t.astype(jnp.bfloat16),
        w3=w3_p.astype(jnp.bfloat16),
        b3=b3_p.astype(jnp.float32).reshape(1, Op),
        hidden_dim=H,
        out_dim=O,
    )


def _plan_tiling(B, H, Op, x_bytes, out_bytes, vmem_cap):
    """Pick a load-balanced batch tile that fits weights + IO + intermediates."""
    # Resident weights (single-buffered bf16) + f32 bias.
    weight_bytes = (2 * H * H + H * Op) * 2 + Op * 4
    # Generation-aware target: bigger tiles where VMEM allows (v5e/v6e 128 MiB).
    target = 512 if vmem_cap >= (96 << 20) else 256
    if B <= target:
        bb = B
    else:
        # Load-balance: equal-ish tiles, rounded up to a sublane multiple.
        n_tiles = pl.cdiv(B, target)
        bb = min(_round_up(pl.cdiv(B, n_tiles), SUBLANE), B)

    budget = vmem_cap - (8 << 20)   # headroom for Mosaic internal scratch

    def footprint(bb_):
        # double-buffered x / out tiles
        io = 2 * bb_ * H * x_bytes + 2 * bb_ * Op * out_bytes
        # compiler-managed temporaries: x bf16, h1/h2 in f32 + bf16, y f32
        tmp = bb_ * (16 * H + 4 * Op)
        return weight_bytes + io + tmp

    while bb > SUBLANE and footprint(bb) > budget:
        bb = max(SUBLANE, _round_up(bb // 2, SUBLANE))
    # TODO(synk): if weight_bytes alone exceeds the budget (very large H,
    # esp. v7x's 64 MiB/TC), switch to a streamed-weight variant: an
    # 'arbitrary' K/N grid axis over W1/W2/W3 tiles with an f32 accumulator
    # instead of holding both HxH weights resident.
    return bb, footprint(bb), weight_bytes


def feed_forward(x, params, *, out_dtype=None):
    """x: [B, hidden]; params: output of prepare_params. Returns [B, out_dim].

    Pass out_dtype=jnp.bfloat16 (and bf16 x) to halve per-step streaming I/O
    once weights are resident.
    """
    B, H = x.shape
    assert H == params["hidden_dim"], "hidden_dim mismatch"
    O = params["out_dim"]
    Op = params["w3"].shape[1]
    out_dtype = out_dtype or x.dtype

    x_bytes = jnp.dtype(x.dtype).itemsize
    out_bytes = jnp.dtype(out_dtype).itemsize
    vmem_cap = _vmem_capacity_bytes()
    block_b, need, weight_bytes = _plan_tiling(B, H, Op, x_bytes, out_bytes, vmem_cap)
    grid_steps = pl.cdiv(B, block_b)

    # Generation-aware VMEM limit: never above per-core capacity minus headroom.
    vmem_limit = int(min(max(need + (4 << 20), 32 << 20),
                         vmem_cap - (8 << 20), 100 << 20))

    # Small grids: don't split over v7x's 2 TCs (each core would DMA its own
    # full weight copy for negligible compute win).
    dim_sem = ("parallel",) if grid_steps > 2 else ("arbitrary",)

    cost = pl.CostEstimate(
        flops=int(2 * B * (2 * H * H + H * Op)),
        transcendentals=int(B * H),
        bytes_accessed=int(B * H * x_bytes + B * Op * out_bytes + weight_bytes),
    )

    weight_mode = pl.Buffered(1)   # constant index map -> single-buffer weights

    out = pl.pallas_call(
        ffn_kernel,
        out_shape=jax.ShapeDtypeStruct((B, Op), out_dtype),
        grid_spec=pltpu.PrefetchScalarGridSpec(
            num_scalar_prefetch=0,
            grid=(grid_steps,),
            in_specs=[
                pl.BlockSpec((block_b, H), lambda i: (i, 0)),
                pl.BlockSpec((H, H), lambda i: (0, 0), pipeline_mode=weight_mode),
                pl.BlockSpec((H, H), lambda i: (0, 0), pipeline_mode=weight_mode),
                pl.BlockSpec((H, Op), lambda i: (0, 0), pipeline_mode=weight_mode),
                pl.BlockSpec((1, Op), lambda i: (0, 0), pipeline_mode=weight_mode),
            ],
            out_specs=pl.BlockSpec((block_b, Op), lambda i: (i, 0)),
        ),
        compiler_params=pltpu.CompilerParams(
            dimension_semantics=dim_sem,
            vmem_limit_bytes=vmem_limit,
        ),
        cost_estimate=cost,
    )(x, params["w1"], params["w2"], params["w3"], params["b3"])

    return out[:, :O] if Op != O else out


def init_params(key, hidden_dim, out_dim, dtype=jnp.float32):
    """Deterministic init mimicking nn.Linear default (uniform +/- 1/sqrt(fan_in)).
    Weights are returned pre-transposed: [in_dim, out_dim]."""
    k1, k2, k3, k4 = jax.random.split(key, 4)
    bound_h = 1.0 / jnp.sqrt(hidden_dim)
    w1_t = jax.random.uniform(k1, (hidden_dim, hidden_dim), dtype, -bound_h, bound_h)
    w2_t = jax.random.uniform(k2, (hidden_dim, hidden_dim), dtype, -bound_h, bound_h)
    w3_t = jax.random.uniform(k3, (hidden_dim, out_dim), dtype, -bound_h, bound_h)
    b3 = jax.random.uniform(k4, (out_dim,), dtype, -bound_h, bound_h)
    return w1_t, w2_t, w3_t, b3


if __name__ == "__main__":
    key = jax.random.PRNGKey(0)
    B, hidden_dim, out_dim = 8, 32, 32

    kx, kp = jax.random.split(key)
    x = jax.random.normal(kx, (B, hidden_dim), jnp.float32)
    w1_t, w2_t, w3_t, b3 = init_params(kp, hidden_dim, out_dim)

    # One-time prep: bf16 cast + lane-dense padding (outside the forward pass).
    params = prepare_params(w1_t, w2_t, w3_t, b3)

    out = feed_forward(x, params)
    out = jax.block_until_ready(out)

    # Reference mirroring the kernel's compute path (bf16 weights/intermediates,
    # f32 accumulation), so tolerances only cover rounding differences.
    def rt(a):  # round-trip through bf16
        return a.astype(jnp.bfloat16).astype(jnp.float32)

    h_ref = jnp.tanh(rt(x) @ rt(w1_t))
    h_ref = rt(h_ref) @ rt(w2_t)
    ref = rt(h_ref) @ rt(w3_t) + b3

    assert out.shape == (B, out_dim)
    assert jnp.allclose(out, ref, atol=2e-2, rtol=2e-2), "mismatch vs reference"

    print("KERNEL_OK")
</pallas_src>

<mosaic_0001>
module attributes {stable_mosaic.version = 11 : i64} {
  func.func @ffn_kernel(%arg0: i32, %arg1: memref<8x32xf32, #tpu.memory_space<vmem>>, %arg2: memref<32x32xbf16, #tpu.memory_space<vmem>>, %arg3: memref<32x32xbf16, #tpu.memory_space<vmem>>, %arg4: memref<32x128xbf16, #tpu.memory_space<vmem>>, %arg5: memref<1x128xf32, #tpu.memory_space<vmem>>, %arg6: memref<8x128xf32, #tpu.memory_space<vmem>>) attributes {dimension_semantics = [#tpu.dimension_semantics<arbitrary>], iteration_bounds = array<i64: 1>, scalar_prefetch = 0 : i64, scratch_operands = 0 : i64, tpu.core_type = #tpu.core_type<tc>, window_params = [{transform_indices = @transform_0, window_bounds = array<i64: 8, 32>}, {pipeline_mode = #tpu.pipeline_mode<synchronous>, transform_indices = @transform_1, window_bounds = array<i64: 32, 32>}, {pipeline_mode = #tpu.pipeline_mode<synchronous>, transform_indices = @transform_2, window_bounds = array<i64: 32, 32>}, {pipeline_mode = #tpu.pipeline_mode<synchronous>, transform_indices = @transform_3, window_bounds = array<i64: 32, 128>}, {pipeline_mode = #tpu.pipeline_mode<synchronous>, transform_indices = @transform_4, window_bounds = array<i64: 1, 128>}, {transform_indices = @transform_5, window_bounds = array<i64: 8, 128>}]} {
    %c0 = arith.constant 0 : index
    %c0_0 = arith.constant 0 : index
    %0 = vector.load %arg1[%c0, %c0_0] : memref<8x32xf32, #tpu.memory_space<vmem>>, vector<8x32xf32>
    %1 = arith.truncf %0 : vector<8x32xf32> to vector<8x32xbf16>
    %c0_1 = arith.constant 0 : index
    %c0_2 = arith.constant 0 : index
    %2 = vector.load %arg2[%c0_1, %c0_2] : memref<32x32xbf16, #tpu.memory_space<vmem>>, vector<32x32xbf16>
    %cst = arith.constant dense<0.000000e+00> : vector<8x32xf32>
    %3 = tpu.matmul %1, %2, %cst {dimension_numbers = #tpu.dot_dimension_numbers<[1], [0], [0], [1], [0, 0, 1, 1], [], []>} : vector<8x32xbf16>, vector<32x32xbf16>, vector<8x32xf32> -> vector<8x32xf32>
    %4 = math.tanh %3 : vector<8x32xf32>
    %5 = arith.truncf %4 : vector<8x32xf32> to vector<8x32xbf16>
    %c0_3 = arith.constant 0 : index
    %c0_4 = arith.constant 0 : index
    %6 = vector.load %arg3[%c0_3, %c0_4] : memref<32x32xbf16, #tpu.memory_space<vmem>>, vector<32x32xbf16>
    %cst_5 = arith.constant dense<0.000000e+00> : vector<8x32xf32>
    %7 = tpu.matmul %5, %6, %cst_5 {dimension_numbers = #tpu.dot_dimension_numbers<[1], [0], [0], [1], [0, 0, 1, 1], [], []>} : vector<8x32xbf16>, vector<32x32xbf16>, vector<8x32xf32> -> vector<8x32xf32>
    %8 = arith.truncf %7 : vector<8x32xf32> to vector<8x32xbf16>
    %c0_6 = arith.constant 0 : index
    %c0_7 = arith.constant 0 : index
    %9 = vector.load %arg4[%c0_6, %c0_7] : memref<32x128xbf16, #tpu.memory_space<vmem>>, vector<32x128xbf16>
    %cst_8 = arith.constant dense<0.000000e+00> : vector<8x128xf32>
    %10 = tpu.matmul %8, %9, %cst_8 {dimension_numbers = #tpu.dot_dimension_numbers<[1], [0], [0], [1], [0, 0, 1, 1], [], []>} : vector<8x32xbf16>, vector<32x128xbf16>, vector<8x128xf32> -> vector<8x128xf32>
    %c0_9 = arith.constant 0 : index
    %c0_10 = arith.constant 0 : index
    %11 = vector.load %arg5[%c0_9, %c0_10] : memref<1x128xf32, #tpu.memory_space<vmem>>, vector<1x128xf32>
    %12 = vector.broadcast %11 : vector<1x128xf32> to vector<8x128xf32>
    %13 = arith.addf %10, %12 : vector<8x128xf32>
    %c0_11 = arith.constant 0 : index
    %c0_12 = arith.constant 0 : index
    %14 = vector.load %arg6[%c0_11, %c0_12] : memref<8x128xf32, #tpu.memory_space<vmem>>, vector<8x128xf32>
    tpu.vector_store %arg6[%c0_11, %c0_12], %13 {strides = array<i32>} : memref<8x128xf32, #tpu.memory_space<vmem>>, vector<8x128xf32>,
    return
  }
  func.func @transform_0(%arg0: i32) -> (i32, i32) {
    %c0_i32 = arith.constant 0 : i32
    %c0_i32_0 = arith.constant 0 : i32
    return %arg0, %c0_i32 : i32, i32
  }
  func.func @transform_1(%arg0: i32) -> (i32, i32) {
    %c0_i32 = arith.constant 0 : i32
    %c0_i32_0 = arith.constant 0 : i32
    %c0_i32_1 = arith.constant 0 : i32
    return %c0_i32, %c0_i32_0 : i32, i32
  }
  func.func @transform_2(%arg0: i32) -> (i32, i32) {
    %c0_i32 = arith.constant 0 : i32
    %c0_i32_0 = arith.constant 0 : i32
    %c0_i32_1 = arith.constant 0 : i32
    return %c0_i32, %c0_i32_0 : i32, i32
  }
  func.func @transform_3(%arg0: i32) -> (i32, i32) {
    %c0_i32 = arith.constant 0 : i32
    %c0_i32_0 = arith.constant 0 : i32
    %c0_i32_1 = arith.constant 0 : i32
    return %c0_i32, %c0_i32_0 : i32, i32
  }
  func.func @transform_4(%arg0: i32) -> (i32, i32) {
    %c0_i32 = arith.constant 0 : i32
    %c0_i32_0 = arith.constant 0 : i32
    %c0_i32_1 = arith.constant 0 : i32
    return %c0_i32, %c0_i32_0 : i32, i32
  }
  func.func @transform_5(%arg0: i32) -> (i32, i32) {
    %c0_i32 = arith.constant 0 : i32
    %c0_i32_0 = arith.constant 0 : i32
    return %arg0, %c0_i32 : i32, i32
  }
}

</mosaic_0001>

<bundles_post_ra>
// kernel: tpu_custom_call.1
= control target key start
LH: loop header
LB: loop body
LE: loop exit
PB: predicated region body
PF: predicated region fallthrough
CT: control target
= control target key end

     0   :  { %10 = vsyncpa [#allocation3], 0  ;;  %s575_s0 = inlined_call_operand.hbm [shape: f32[8,32], index: 0, kind: input, shape index: {}]   ;;  %s576_s1 = inlined_call_operand.hbm [shape: bf16[32,32], index: 1, kind: input, shape index: {}]   ;;  %s577_s2 = inlined_call_operand.hbm [shape: bf16[32,32], index: 2, kind: input, shape index: {}]   ;;  %s578_s3 = inlined_call_operand.hbm [shape: bf16[32,128], index: 3, kind: input, shape index: {}]   ;;  %s579_s4 = inlined_call_operand.vmem [shape: f32[1,128], index: 4, kind: input, shape index: {}]   ;;  %s580_s5 = inlined_call_operand.hbm [shape: f32[8,128], index: 5, kind: output, shape index: {}]  }
   0x1   :  { %11 = vsyncpa [#allocation6], 0 }
   0x2   :  { %12 = vsyncpa [#allocation9], 0 }
   0x3   :  { %13 = vsyncpa [#allocation4], 0  ;;  %s461_s18 = smov [#allocation5]   ;;  %s343_s22 = scalar_lea.hbm %s576_s1, 256 }
   0x4   :  { %s29_s19 = sshll.u32 %s461_s18, 4  ;;  %p344_p0 = scmp.ne.s32.totalorder %s576_s1, %s343_s22  ;;  %s30_s19 = int_to_ptr.vmem [resolvable:$true] %s29_s19 }
   0x5   :  { %p347_p1 = scmp.lt.u32.totalorder %s343_s22, %s576_s1 }
   0x7   :  { %p349_p2 = pnand %p347_p1, %p344_p0 }
   0x9   :  { %352 = shalt.err (!%p349_p2)
}
   0xa   :  { %s353_s27 = scalar_lea.vmem %s30_s19, 256  ;;  %p358_p4 = scmp.lt.s32.totalorder %s30_s19, %s30_s19 }
   0xb   :  { %p354_p3 = scmp.ne.s32.totalorder %s30_s19, %s353_s27  ;;  %p359_p5 = scmp.lt.s32.totalorder %s353_s27, %s353_s27 }
   0xd   :  { %p360_p6 = por %p359_p5, %p358_p4 }
   0xf   :  { %p361_p7 = pnand %p360_p6, %p354_p3 }
  0x11   :  { %364 = shalt.err (!%p361_p7)
}
  0x12   :  { %s462_s28 = smov 64   ;;  %s463_s29 = smov 4  }
  0x13   :  { %35 = dma.hbm_to_vmem [thread:$0]  %s576_s1, 256, %s30_s19, [#allocation6], %s462_s28, %s462_s28, %s463_s29  }
  0x14   :  { %s464_s7 = smov [#allocation2]   ;;  %s465_s9 = smov [#allocation7]  }
  0x15   :  { %s20_s8 = sshll.u32 %s464_s7, 4  ;;  %s41_s10 = sshll.u32 %s465_s9, 4  ;;  %s21_s8 = int_to_ptr.vmem [resolvable:$true] %s20_s8  ;;  %s42_s10 = int_to_ptr.vmem [resolvable:$true] %s41_s10 }
  0x16   :  { %s365_s13 = scalar_lea.hbm %s575_s0, 128 }
  0x17   :  { %p366_p8 = scmp.ne.s32.totalorder %s575_s0, %s365_s13  ;;  %p369_p9 = scmp.lt.u32.totalorder %s365_s13, %s575_s0 }
  0x19   :  { %p371_p10 = pnand %p369_p9, %p366_p8 }
  0x1b   :  { %374 = shalt.err (!%p371_p10)
}
  0x1c   :  { %s375_s1 = scalar_lea.vmem %s21_s8, 128  ;;  %p380_p12 = scmp.lt.s32.totalorder %s21_s8, %s21_s8 }
  0x1d   :  { %p376_p11 = scmp.ne.s32.totalorder %s21_s8, %s375_s1  ;;  %p381_p13 = scmp.lt.s32.totalorder %s375_s1, %s375_s1 }
  0x1f   :  { %p382_p0 = por %p381_p13, %p380_p12 }
  0x21   :  { %p383_p1 = pnand %p382_p0, %p376_p11 }
  0x23   :  { %386 = shalt.err (!%p383_p1)
}
  0x24   :  { %23 = dma.hbm_to_vmem [thread:$0]  %s575_s0, 128, %s21_s8, [#allocation3]  }
  0x25   :  { %s387_s22 = scalar_lea.hbm %s577_s2, 256 }
  0x26   :  { %p388_p2 = scmp.ne.s32.totalorder %s577_s2, %s387_s22  ;;  %p391_p3 = scmp.lt.u32.totalorder %s387_s22, %s577_s2 }
  0x28   :  { %p393_p4 = pnand %p391_p3, %p388_p2 }
  0x2a   :  { %396 = shalt.err (!%p393_p4)
}
  0x2b   :  { %s397_s27 = scalar_lea.vmem %s42_s10, 256  ;;  %p402_p6 = scmp.lt.s32.totalorder %s42_s10, %s42_s10 }
  0x2c   :  { %p398_p5 = scmp.ne.s32.totalorder %s42_s10, %s397_s27  ;;  %p403_p7 = scmp.lt.s32.totalorder %s397_s27, %s397_s27 }
  0x2e   :  { %p404_p8 = por %p403_p7, %p402_p6 }
  0x30   :  { %p405_p9 = pnand %p404_p8, %p398_p5 }
  0x32   :  { %408 = shalt.err (!%p405_p9)
}
  0x33   :  { %47 = dma.hbm_to_vmem [thread:$0]  %s577_s2, 256, %s42_s10, [#allocation6], %s462_s28, %s462_s28, %s463_s29  }
  0x34   :  { %s466_s6 = smov [#allocation8]   ;;  %s409_s11 = scalar_lea.hbm %s578_s3, 256 }
  0x35   :  { %s53_s7 = sshll.u32 %s466_s6, 4  ;;  %p410_p10 = scmp.ne.s32.totalorder %s578_s3, %s409_s11  ;;  %s54_s7 = int_to_ptr.vmem [resolvable:$true] %s53_s7 }
  0x36   :  { %p413_p11 = scmp.lt.u32.totalorder %s409_s11, %s578_s3 }
  0x38   :  { %p415_p12 = pnand %p413_p11, %p410_p10 }
  0x3a   :  { %418 = shalt.err (!%p415_p12)
}
  0x3b   :  { %s419_s16 = scalar_lea.vmem %s54_s7, 256  ;;  %p424_p0 = scmp.lt.s32.totalorder %s54_s7, %s54_s7 }
  0x3c   :  { %p420_p13 = scmp.ne.s32.totalorder %s54_s7, %s419_s16  ;;  %p425_p1 = scmp.lt.s32.totalorder %s419_s16, %s419_s16 }
  0x3e   :  { %p426_p2 = por %p425_p1, %p424_p0 }
  0x40   :  { %p427_p3 = pnand %p426_p2, %p420_p13 }
  0x42   :  { %430 = shalt.err (!%p427_p3)
}
  0x43   :  { %59 = dma.hbm_to_vmem [thread:$0]  %s578_s3, 256, %s54_s7, [#allocation9], %s462_s28, %s462_s28, %s463_s29  }
  0x44   :  { %453 = dma.done.wait [#allocation3], 128  }
  0x45   :  { %454 = vsyncadd [#allocation3], 4294967168 }
  0x46   :  { %455 = dma.done.wait [#allocation6], 512  }
  0x47   :  { %456 = vsyncadd [#allocation6], 4294966784 }
  0x48   :  { %457 = dma.done.wait [#allocation9], 256  }
  0x49   :  { %458 = vsyncadd [#allocation9], 4294967040  ;;  %v467_v0 = vmov 0.0   ;;  %vm468_vm0 = vmmov 0   ;;  %v335_v1 = vld [vmem:[#allocation5] sm:$0xff]   ;;  %v336_v2 = vld [vmem:[#allocation5 + $0x8] sm:$0xff]  }
  0x4a   :  { %302 = vmatprep.subr.bf16.mxu0 %v467_v0  ;;  %306 = vmatprep.mubr.msk.bf16.mxu0 %vm468_vm0, %v467_v0  ;;  %v75_v3 = vld [vmem:[#allocation2] sm:$0xff]  ;;  %vm93_vm1 = vcmask 261120   ;;  %v337_v5 = vld [vmem:[#allocation7] sm:$0xff]   ;;  %v339_v7 = vld [vmem:[#allocation8] sm:$0xff]   ;;  %s469_s29 = smov [#allocation10]  }
  0x4b   :  { %310 = vmatprep.subr.bf16.mxu1 %v467_v0  ;;  %314 = vmatprep.mubr.msk.bf16.mxu1 %vm468_vm0, %v467_v0  ;;  %v76_v4 = vpack.c.bf16 %v75_v3, %v75_v3  ;;  %v338_v6 = vld [vmem:[#allocation7 + $0x8] sm:$0xff]   ;;  %v340_v8 = vld [vmem:[#allocation8 + $0x8] sm:$0xff]   ;;  %s272_s17 = sshll.u32 %s469_s29, 4  ;;  %s273_s17 = int_to_ptr.vmem [resolvable:$true] %s272_s17 }
  0x4c   :  { %303 = vmatpush3.bf16.msra.mxu0 %v335_v1  ;;  %311 = vmatpush3.bf16.msra.mxu1 %v337_v5  ;;  %v289_v20 = vld [vmem:[%s579_s4] ss:$0 sm:$0xff]  ;;  %s431_s1 = scalar_lea.vmem %s273_s17, 128  ;;  %p436_p5 = scmp.lt.s32.totalorder %s273_s17, %s273_s17 }
  0x4d   :  { %304 = vmatprep.subr.bf16.mxu0 %v467_v0  ;;  %312 = vmatprep.subr.bf16.mxu1 %v467_v0  ;;  %p432_p4 = scmp.ne.s32.totalorder %s273_s17, %s431_s1  ;;  %p437_p6 = scmp.lt.s32.totalorder %s431_s1, %s431_s1 }
  0x4f   :  { %p438_p7 = por %p437_p6, %p436_p5 }
  0x50   :  { %305 = vmatpush3.bf16.msra.mxu0 %v336_v2  ;;  %313 = vmatpush3.bf16.msra.mxu1 %v338_v6 }
  0x51   :  { %318 = vmatprep.subr.bf16.mxu0 %v467_v0  ;;  %p439_p8 = pnand %p438_p7, %p432_p4 }
  0x53   :  { %307 = vmatmul.mubr.msk.bf16.vlgmr.msra.gmra.mrb[0].mxu0 %vm93_vm1, %v76_v4 }
  0x54   :  { %322 = vmatprep.mubr.msk.bf16.mxu0 %vm468_vm0, %v467_v0  ;;  %319 = vmatpush3.bf16.msra.mxu0 %v339_v7 }
  0x55   :  { %320 = vmatprep.subr.bf16.mxu0 %v467_v0 }
  0x58   :  { %321 = vmatpush3.bf16.msra.mxu0 %v340_v8 }
 0x126   :  { %v131_v9 = vpop.f32.mrb[0].mxu0 }
 0x127   :  { %341 = vtanh.f32 %v131_v9  ;;  %v308_v10 = vpop.f32.mrb[1].mxu0 }
 0x128   :  { %v134_v11 = vpop.f32.mrb[2].mxu0 }
 0x129   :  { %v309_v12 = vpop.f32.mrb[3].mxu0 }
 0x131   :  { %v342_v13 = vpop.eup %341 }
 0x132   :  { %v138_v14 = vpack.c.bf16 %v342_v13, %v342_v13 }
 0x134   :  { %315 = vmatmul.mubr.msk.bf16.vlgmr.msra.gmra.mrb[0].mxu1 %vm93_vm1, %v138_v14 }
 0x207   :  { %v192_v15 = vpop.f32.mrb[0].mxu1 }
 0x208   :  { %v198_v16 = vpack.c.bf16 %v192_v15, %v192_v15  ;;  %v316_v17 = vpop.f32.mrb[1].mxu1 }
 0x209   :  { %v195_v18 = vpop.f32.mrb[2].mxu1 }
 0x20a   :  { %v317_v19 = vpop.f32.mrb[3].mxu1  ;;  %323 = vmatmul.mubr.msk.bf16.vlgmr.msra.gmra.mrb[4].mxu0 %vm93_vm1, %v198_v16 }
 0x2dd   :  { %v259_v21 = vpop.f32.mrb[4].mxu0 }
 0x2de   :  { %v260_v22 = vadd.f32 %v289_v20, %v259_v21  ;;  %v324_v23 = vpop.f32.mrb[5].mxu0 }
 0x2df   :  { %v262_v24 = vpop.f32.mrb[6].mxu0 }
 0x2e0   :  { %265 = vst [vmem:[#allocation10] sm:$0xff] %v260_v22  ;;  %v325_v25 = vpop.f32.mrb[7].mxu0 }
 0x2e1   :  { %442 = shalt.err (!%p439_p8)
}
 0x2e2   :  { %s443_s4 = scalar_lea.hbm %s580_s5, 128 }
 0x2e3   :  { %p444_p9 = scmp.ne.s32.totalorder %s580_s5, %s443_s4  ;;  %p447_p10 = scmp.lt.u32.totalorder %s443_s4, %s580_s5 }
 0x2e5   :  { %p449_p11 = pnand %p447_p10, %p444_p9 }
 0x2e7   :  { %452 = shalt.err (!%p449_p11)
}
 0x2e8   :  { %275 = dma.vmem_to_hbm [thread:$0]  %s273_s17, 128, %s580_s5, [#allocation4]  }
 0x2e9   :  { %459 = dma.done.wait [#allocation4], 128  }
 0x2ea   :  { %460 = vsyncadd [#allocation4], 4294967168 }
 0x2eb   :  { %279 = vsyncpa [#allocation3], 1 }
 0x2ec   :  { %280 = vsyncpa [#allocation6], 1 }
 0x2ed   :  { %281 = vsyncpa [#allocation9], 1 }
 0x2ee   :  { %282 = vsyncpa [#allocation4], 1 }

</bundles_post_ra>
